<compile_context>
chip_gen: v7x
topology: tpu7x:2x2x1
jax: 0.10.0
libtpu: 0.0.40
codegen_flags: <defaults>
</compile_context>

<pallas_src>
import jax
import jax.numpy as jnp
from jax.experimental import pallas as pl
from jax.experimental.pallas import tpu as pltpu


_INV_SQRT2 = 0.7071067811865476
_MiB = 1024 * 1024


def _cdiv(a, b):
    return -(-a // b)


def _round_up(n, m):
    return _cdiv(n, m) * m


def _pad2d(a, rows, cols):
    pr, pc = rows - a.shape[0], cols - a.shape[1]
    if pr == 0 and pc == 0:
        return a
    return jnp.pad(a, ((0, pr), (0, pc)))


def _pad_feature_dim(d):
    """Lane-dense padding: always a multiple of 128; bump to 256 (v6e/v7x MXU width)
    only when it is nearly free (<= 6.25% extra padding)."""
    dp = _round_up(d, 128)
    dp256 = _round_up(d, 256)
    if dp256 != dp and dp256 * 16 <= dp * 17:
        dp = dp256
    return dp


def _vmem_capacity_bytes():
    """Per-TensorCore VMEM capacity; conservative (v7x-safe) fallback if unknown."""
    try:
        info = pltpu.get_tpu_info()
        cap = getattr(info, "vmem_capacity_bytes", None)
        if cap:
            return int(cap)
    except Exception:
        pass
    return 64 * _MiB


def _working_set_bytes(tm, th, dp, out_bytes):
    """Estimated resident VMEM: double-buffered x/W1/W2/b1/b2/out + f32 accumulator."""
    in_b = 2  # bf16 MXU operands
    return (2 * tm * dp * in_b          # x row tile
            + 2 * dp * th * in_b        # W1 hidden chunk
            + 2 * th * dp * in_b        # W2 hidden chunk
            + 2 * th * 4 + 2 * dp * 4   # b1, b2 (f32)
            + 2 * tm * dp * out_bytes   # output tile
            + tm * dp * 4)              # f32 accumulator scratch


def _make_mlp_kernel(gelu_approx):
    def mlp_kernel(x_ref, w1_ref, b1_ref, w2_ref, b2_ref, o_ref, acc_ref):
        """One (tm, Dp) row tile x one th-wide hidden chunk of Linear->GELU->Linear,
        accumulated over hidden chunks in an f32 VMEM scratch."""
        k = pl.program_id(1)

        @pl.when(k == 0)
        def _():
            acc_ref[...] = jnp.zeros_like(acc_ref)

        # First linear chunk: (tm, Dp)bf16 @ (Dp, th)bf16 -> f32 on the MXU.
        h = jnp.dot(x_ref[...], w1_ref[...], preferred_element_type=jnp.float32)
        h = h + b1_ref[...]  # (1, th) broadcasts over rows; bias in f32
        if gelu_approx:
            # tanh-approx GELU: transcendental lands on the EUP slot (VALU relief on v6e/v7x).
            h = jax.nn.gelu(h, approximate=True)
        else:
            # Exact GELU (PyTorch nn.GELU default, approximate='none'): 0.5*x*(1+erf(x/sqrt(2)))
            h = 0.5 * h * (1.0 + jax.lax.erf(h * _INV_SQRT2))
        # Second linear chunk: (tm, th)bf16 @ (th, Dp)bf16 -> f32, accumulate over hidden chunks.
        acc_ref[...] += jnp.dot(h.astype(w2_ref.dtype), w2_ref[...],
                                preferred_element_type=jnp.float32)

        @pl.when(k == pl.num_programs(1) - 1)
        def _():
            # Dropout(p) in eval mode is identity.
            o_ref[...] = (acc_ref[...] + b2_ref[...]).astype(o_ref.dtype)

    return mlp_kernel


def mlp_pallas(x, w1, b1, w2, b2, *, tm=None, th=None, out_dtype=None, gelu_approx=False):
    """x: (M, D). w1: (D, H), b1: (H,), w2: (H, D), b2: (D,). Returns (M, D) in out_dtype (default x.dtype)."""
    M, D = x.shape
    H = w1.shape[1]
    out_dtype = x.dtype if out_dtype is None else jnp.dtype(out_dtype)
    out_bytes = jnp.dtype(out_dtype).itemsize

    # --- per-generation sizing ---------------------------------------------
    vmem_cap = _vmem_capacity_bytes()
    if vmem_cap >= 96 * _MiB:
        # v5e / v6e: 128 MiB physical VMEM, 1 TensorCore per chip.
        vmem_limit = 100 * _MiB
        tm_cap_default, th_default = 1024, 1024
        num_tc = 1
    else:
        # v7x: 64 MiB per TC, 2 TCs per chip (also the conservative fallback).
        vmem_limit = 56 * _MiB
        tm_cap_default, th_default = 512, 512
        num_tc = 2
    budget = int(vmem_limit * 0.9)

    # --- lane-dense feature dims ---------------------------------------------
    Dp = _pad_feature_dim(D)
    Hp128 = _round_up(H, 128)

    # --- row tile: balanced, multiple of 16 (bf16 sublane packing) -----------
    if tm is None:
        n_tiles = _cdiv(M, tm_cap_default)
        if n_tiles > 1 and n_tiles % num_tc != 0:
            n_tiles += num_tc - (n_tiles % num_tc)  # shard cleanly across TensorCores
        tm = _round_up(_cdiv(M, n_tiles), 16)
    tm = max(16, _round_up(int(tm), 16))
    Mp = _round_up(M, tm)

    # --- hidden-dim chunk -----------------------------------------------------
    if th is None:
        th = min(th_default, Hp128)
    th = max(128, min(_round_up(int(th), 128), Hp128))
    # Shrink th, then tm, until the double-buffered working set fits the VMEM budget.
    while _working_set_bytes(tm, th, Dp, out_bytes) > budget and th > 128:
        th = max(128, _round_up(th // 2, 128))
    while _working_set_bytes(tm, th, Dp, out_bytes) > budget and tm > 16:
        tm = max(16, _round_up(tm // 2, 16))
        Mp = _round_up(M, tm)
    Hp = _round_up(Hp128, th)

    # --- wrapper-side layout & dtype prep (cheap XLA ops) ---------------------
    # bf16 operands for the MXU (f32 accumulation in-kernel); biases stay f32.
    # Zero padding contributes exactly 0 to every dot product (and GELU(0)=0);
    # padded output rows/cols are sliced off below.
    xp = _pad2d(x.astype(jnp.bfloat16), Mp, Dp)
    w1p = _pad2d(w1.astype(jnp.bfloat16), Dp, Hp)
    w2p = _pad2d(w2.astype(jnp.bfloat16), Hp, Dp)
    b1p = _pad2d(b1.reshape(1, H).astype(jnp.float32), 1, Hp)
    b2p = _pad2d(b2.reshape(1, D).astype(jnp.float32), 1, Dp)

    grid = (Mp // tm, Hp // th)

    out = pl.pallas_call(
        _make_mlp_kernel(gelu_approx),
        out_shape=jax.ShapeDtypeStruct((Mp, Dp), out_dtype),
        grid_spec=pltpu.PrefetchScalarGridSpec(
            num_scalar_prefetch=0,
            grid=grid,
            in_specs=[
                pl.BlockSpec((tm, Dp), lambda i, k: (i, 0)),   # x row tile (revisited across k -> no re-DMA)
                pl.BlockSpec((Dp, th), lambda i, k: (0, k)),   # W1 hidden chunk
                pl.BlockSpec((1, th), lambda i, k: (0, k)),    # b1 hidden chunk
                pl.BlockSpec((th, Dp), lambda i, k: (k, 0)),   # W2 hidden chunk
                pl.BlockSpec((1, Dp), lambda i, k: (0, 0)),    # b2
            ],
            out_specs=pl.BlockSpec((tm, Dp), lambda i, k: (i, 0)),
            scratch_shapes=[pltpu.VMEM((tm, Dp), jnp.float32)],
        ),
        compiler_params=pltpu.CompilerParams(
            dimension_semantics=("parallel", "arbitrary"),
            vmem_limit_bytes=vmem_limit,
        ),
    )(xp, w1p, b1p, w2p, b2p)

    return out[:M, :D]


def mlp_reference_bf16(x, w1, b1, w2, b2):
    """Pure-JAX reference mirroring the kernel numerics (bf16 MXU operands, f32 accumulation)."""
    h = jnp.dot(x.astype(jnp.bfloat16), w1.astype(jnp.bfloat16),
                preferred_element_type=jnp.float32) + b1
    h = 0.5 * h * (1.0 + jax.lax.erf(h * _INV_SQRT2))
    o = jnp.dot(h.astype(jnp.bfloat16), w2.astype(jnp.bfloat16),
                preferred_element_type=jnp.float32) + b2
    return o.astype(x.dtype)


def mlp_reference_f32(x, w1, b1, w2, b2):
    h = x @ w1 + b1
    h = 0.5 * h * (1.0 + jax.lax.erf(h * _INV_SQRT2))
    return h @ w2 + b2


if __name__ == "__main__":
    # Module hyperparameters (small, consistent with the forward).
    embed_dim = 32
    mlp_multiplier = 4
    dropout_level = 0.0        # eval mode -> identity
    hidden = mlp_multiplier * embed_dim  # 128
    batch, seq = 2, 8

    key = jax.random.PRNGKey(0)
    kx, kw1, kb1, kw2, kb2 = jax.random.split(key, 5)

    # Deterministic "PyTorch-style" uniform(-1/sqrt(fan_in), 1/sqrt(fan_in)) init.
    lim1 = 1.0 / jnp.sqrt(embed_dim)
    lim2 = 1.0 / jnp.sqrt(hidden)
    w1 = jax.random.uniform(kw1, (embed_dim, hidden), jnp.float32, -lim1, lim1)
    b1 = jax.random.uniform(kb1, (hidden,), jnp.float32, -lim1, lim1)
    w2 = jax.random.uniform(kw2, (hidden, embed_dim), jnp.float32, -lim2, lim2)
    b2 = jax.random.uniform(kb2, (embed_dim,), jnp.float32, -lim2, lim2)
    x = jax.random.normal(kx, (batch, seq, embed_dim), jnp.float32)

    x_flat = x.reshape(batch * seq, embed_dim)
    out_flat = mlp_pallas(x_flat, w1, b1, w2, b2)
    out = out_flat.reshape(batch, seq, embed_dim)
    jax.block_until_ready(out)

    # Strict check vs. a reference that mirrors the kernel's bf16/f32 numerics.
    ref_bf16 = mlp_reference_bf16(x_flat, w1, b1, w2, b2).reshape(batch, seq, embed_dim)
    assert jnp.allclose(out, ref_bf16, atol=1e-4, rtol=1e-4), "mismatch vs bf16-mirroring reference"
    # Loose check vs. pure-f32 math (difference is bf16 input rounding only).
    ref_f32 = mlp_reference_f32(x_flat, w1, b1, w2, b2).reshape(batch, seq, embed_dim)
    assert jnp.allclose(out, ref_f32, atol=3e-2, rtol=3e-2), "mismatch vs f32 reference beyond bf16 rounding"

    # Second check exercising multi-step tiling: 2 parallel row tiles,
    # 3 hidden-dim accumulation steps, and D padded 96 -> 128 lanes.
    D2, H2, M2 = 96, 384, 128
    k2 = jax.random.split(key, 5)
    w1b = jax.random.uniform(k2[0], (D2, H2), jnp.float32, -1.0, 1.0) / jnp.sqrt(D2)
    b1b = jax.random.uniform(k2[1], (H2,), jnp.float32, -1.0, 1.0) / jnp.sqrt(D2)
    w2b = jax.random.uniform(k2[2], (H2, D2), jnp.float32, -1.0, 1.0) / jnp.sqrt(H2)
    b2b = jax.random.uniform(k2[3], (D2,), jnp.float32, -1.0, 1.0) / jnp.sqrt(H2)
    xb = jax.random.normal(k2[4], (M2, D2), jnp.float32)
    out_b = mlp_pallas(xb, w1b, b1b, w2b, b2b, tm=64, th=128)
    jax.block_until_ready(out_b)
    ref_b = mlp_reference_bf16(xb, w1b, b1b, w2b, b2b)
    assert jnp.allclose(out_b, ref_b, atol=1e-4, rtol=1e-4), "mismatch on tiled case"

    # Third check exercising the auto (balanced) row tiling with M not a multiple of 16.
    D3, H3, M3 = 96, 256, 530
    k3 = jax.random.split(jax.random.PRNGKey(1), 5)
    w1c = jax.random.uniform(k3[0], (D3, H3), jnp.float32, -1.0, 1.0) / jnp.sqrt(D3)
    b1c = jax.random.uniform(k3[1], (H3,), jnp.float32, -1.0, 1.0) / jnp.sqrt(D3)
    w2c = jax.random.uniform(k3[2], (H3, D3), jnp.float32, -1.0, 1.0) / jnp.sqrt(H3)
    b2c = jax.random.uniform(k3[3], (D3,), jnp.float32, -1.0, 1.0) / jnp.sqrt(H3)
    xc = jax.random.normal(k3[4], (M3, D3), jnp.float32)
    out_c = mlp_pallas(xc, w1c, b1c, w2c, b2c)
    jax.block_until_ready(out_c)
    ref_c = mlp_reference_bf16(xc, w1c, b1c, w2c, b2c)
    assert jnp.allclose(out_c, ref_c, atol=1e-4, rtol=1e-4), "mismatch on balanced-tiling case"

    print("KERNEL_OK")
</pallas_src>

<mosaic_0001>
module attributes {stable_mosaic.version = 11 : i64} {
  func.func @mlp_kernel(%arg0: i32, %arg1: i32, %arg2: memref<16x128xbf16, #tpu.memory_space<vmem>>, %arg3: memref<128x128xbf16, #tpu.memory_space<vmem>>, %arg4: memref<1x128xf32, #tpu.memory_space<vmem>>, %arg5: memref<128x128xbf16, #tpu.memory_space<vmem>>, %arg6: memref<1x128xf32, #tpu.memory_space<vmem>>, %arg7: memref<16x128xf32, #tpu.memory_space<vmem>>, %arg8: memref<16x128xf32, #tpu.memory_space<vmem>>) attributes {dimension_semantics = [#tpu.dimension_semantics<parallel>, #tpu.dimension_semantics<arbitrary>], iteration_bounds = array<i64: 1, 1>, scalar_prefetch = 0 : i64, scratch_operands = 1 : i64, tpu.core_type = #tpu.core_type<tc>, window_params = [{transform_indices = @transform_0, window_bounds = array<i64: 16, 128>}, {transform_indices = @transform_1, window_bounds = array<i64: 128, 128>}, {transform_indices = @transform_2, window_bounds = array<i64: 1, 128>}, {transform_indices = @transform_3, window_bounds = array<i64: 128, 128>}, {pipeline_mode = #tpu.pipeline_mode<synchronous>, transform_indices = @transform_4, window_bounds = array<i64: 1, 128>}, {transform_indices = @transform_5, window_bounds = array<i64: 16, 128>}]} {
    %c0_i32 = arith.constant 0 : i32
    %0 = arith.cmpi eq, %arg1, %c0_i32 : i32
    %1 = arith.extui %0 : i1 to i32
    %c0_i32_0 = arith.constant 0 : i32
    %2 = arith.cmpi ne, %1, %c0_i32_0 : i32
    scf.if %2 {
      %cst_18 = arith.constant 0.000000e+00 : f32
      %26 = vector.broadcast %cst_18 : f32 to vector<16x128xf32>
      %c0_19 = arith.constant 0 : index
      %c0_20 = arith.constant 0 : index
      %27 = vector.load %arg8[%c0_19, %c0_20] : memref<16x128xf32, #tpu.memory_space<vmem>>, vector<16x128xf32>
      tpu.vector_store %arg8[%c0_19, %c0_20], %26 {strides = array<i32>} : memref<16x128xf32, #tpu.memory_space<vmem>>, vector<16x128xf32>,
    } else {
    }
    %c0 = arith.constant 0 : index
    %c0_1 = arith.constant 0 : index
    %3 = vector.load %arg2[%c0, %c0_1] : memref<16x128xbf16, #tpu.memory_space<vmem>>, vector<16x128xbf16>
    %c0_2 = arith.constant 0 : index
    %c0_3 = arith.constant 0 : index
    %4 = vector.load %arg3[%c0_2, %c0_3] : memref<128x128xbf16, #tpu.memory_space<vmem>>, vector<128x128xbf16>
    %cst = arith.constant dense<0.000000e+00> : vector<16x128xf32>
    %5 = tpu.matmul %3, %4, %cst {dimension_numbers = #tpu.dot_dimension_numbers<[1], [0], [0], [1], [0, 0, 1, 1], [], []>} : vector<16x128xbf16>, vector<128x128xbf16>, vector<16x128xf32> -> vector<16x128xf32>
    %c0_4 = arith.constant 0 : index
    %c0_5 = arith.constant 0 : index
    %6 = vector.load %arg4[%c0_4, %c0_5] : memref<1x128xf32, #tpu.memory_space<vmem>>, vector<1x128xf32>
    %7 = vector.broadcast %6 : vector<1x128xf32> to vector<16x128xf32>
    %8 = arith.addf %5, %7 : vector<16x128xf32>
    %cst_6 = arith.constant 5.000000e-01 : f32
    %9 = vector.broadcast %cst_6 : f32 to vector<16x128xf32>
    %10 = arith.mulf %9, %8 : vector<16x128xf32>
    %cst_7 = arith.constant 0.707106769 : f32
    %11 = vector.broadcast %cst_7 : f32 to vector<16x128xf32>
    %12 = arith.mulf %8, %11 : vector<16x128xf32>
    %13 = math.erf %12 : vector<16x128xf32>
    %cst_8 = arith.constant 1.000000e+00 : f32
    %14 = vector.broadcast %cst_8 : f32 to vector<16x128xf32>
    %15 = arith.addf %14, %13 : vector<16x128xf32>
    %16 = arith.mulf %10, %15 : vector<16x128xf32>
    %c0_9 = arith.constant 0 : index
    %c0_10 = arith.constant 0 : index
    %17 = vector.load %arg8[%c0_9, %c0_10] : memref<16x128xf32, #tpu.memory_space<vmem>>, vector<16x128xf32>
    %18 = arith.truncf %16 : vector<16x128xf32> to vector<16x128xbf16>
    %c0_11 = arith.constant 0 : index
    %c0_12 = arith.constant 0 : index
    %19 = vector.load %arg5[%c0_11, %c0_12] : memref<128x128xbf16, #tpu.memory_space<vmem>>, vector<128x128xbf16>
    %cst_13 = arith.constant dense<0.000000e+00> : vector<16x128xf32>
    %20 = tpu.matmul %18, %19, %cst_13 {dimension_numbers = #tpu.dot_dimension_numbers<[1], [0], [0], [1], [0, 0, 1, 1], [], []>} : vector<16x128xbf16>, vector<128x128xbf16>, vector<16x128xf32> -> vector<16x128xf32>
    %21 = arith.addf %17, %20 : vector<16x128xf32>
    %c0_14 = arith.constant 0 : index
    %c0_15 = arith.constant 0 : index
    %22 = vector.load %arg8[%c0_14, %c0_15] : memref<16x128xf32, #tpu.memory_space<vmem>>, vector<16x128xf32>
    tpu.vector_store %arg8[%c0_14, %c0_15], %21 {strides = array<i32>} : memref<16x128xf32, #tpu.memory_space<vmem>>, vector<16x128xf32>,
    %c0_i32_16 = arith.constant 0 : i32
    %23 = arith.cmpi eq, %arg1, %c0_i32_16 : i32
    %24 = arith.extui %23 : i1 to i32
    %c0_i32_17 = arith.constant 0 : i32
    %25 = arith.cmpi ne, %24, %c0_i32_17 : i32
    scf.if %25 {
      %c0_18 = arith.constant 0 : index
      %c0_19 = arith.constant 0 : index
      %26 = vector.load %arg8[%c0_18, %c0_19] : memref<16x128xf32, #tpu.memory_space<vmem>>, vector<16x128xf32>
      %c0_20 = arith.constant 0 : index
      %c0_21 = arith.constant 0 : index
      %27 = vector.load %arg6[%c0_20, %c0_21] : memref<1x128xf32, #tpu.memory_space<vmem>>, vector<1x128xf32>
      %28 = vector.broadcast %27 : vector<1x128xf32> to vector<16x128xf32>
      %29 = arith.addf %26, %28 : vector<16x128xf32>
      %c0_22 = arith.constant 0 : index
      %c0_23 = arith.constant 0 : index
      %30 = vector.load %arg7[%c0_22, %c0_23] : memref<16x128xf32, #tpu.memory_space<vmem>>, vector<16x128xf32>
      tpu.vector_store %arg7[%c0_22, %c0_23], %29 {strides = array<i32>} : memref<16x128xf32, #tpu.memory_space<vmem>>, vector<16x128xf32>,
    } else {
    }
    return
  }
  func.func @transform_0(%arg0: i32, %arg1: i32) -> (i32, i32) {
    %c0_i32 = arith.constant 0 : i32
    %c0_i32_0 = arith.constant 0 : i32
    return %arg0, %c0_i32 : i32, i32
  }
  func.func @transform_1(%arg0: i32, %arg1: i32) -> (i32, i32) {
    %c0_i32 = arith.constant 0 : i32
    %c0_i32_0 = arith.constant 0 : i32
    return %c0_i32, %arg1 : i32, i32
  }
  func.func @transform_2(%arg0: i32, %arg1: i32) -> (i32, i32) {
    %c0_i32 = arith.constant 0 : i32
    %c0_i32_0 = arith.constant 0 : i32
    return %c0_i32, %arg1 : i32, i32
  }
  func.func @transform_3(%arg0: i32, %arg1: i32) -> (i32, i32) {
    %c0_i32 = arith.constant 0 : i32
    %c0_i32_0 = arith.constant 0 : i32
    return %arg1, %c0_i32 : i32, i32
  }
  func.func @transform_4(%arg0: i32, %arg1: i32) -> (i32, i32) {
    %c0_i32 = arith.constant 0 : i32
    %c0_i32_0 = arith.constant 0 : i32
    %c0_i32_1 = arith.constant 0 : i32
    return %c0_i32, %c0_i32_0 : i32, i32
  }
  func.func @transform_5(%arg0: i32, %arg1: i32) -> (i32, i32) {
    %c0_i32 = arith.constant 0 : i32
    %c0_i32_0 = arith.constant 0 : i32
    return %arg0, %c0_i32 : i32, i32
  }
}

</mosaic_0001>

<bundles_post_ra>
// kernel: tpu_custom_call.1
= control target key start
LH: loop header
LB: loop body
LE: loop exit
PB: predicated region body
PF: predicated region fallthrough
CT: control target
= control target key end

     0   :  { %10 = vsyncpa [#allocation4], 0  ;;  %s657_s0 = inlined_call_operand.hbm [shape: bf16[16,128], index: 0, kind: input, shape index: {}]   ;;  %s658_s1 = inlined_call_operand.hbm [shape: bf16[128,128], index: 1, kind: input, shape index: {}]   ;;  %s659_s2 = inlined_call_operand.vmem [shape: f32[1,128], index: 2, kind: input, shape index: {}]   ;;  %s660_s3 = inlined_call_operand.hbm [shape: bf16[128,128], index: 3, kind: input, shape index: {}]   ;;  %s661_s4 = inlined_call_operand.vmem [shape: f32[1,128], index: 4, kind: input, shape index: {}]   ;;  %s662_s5 = inlined_call_operand.hbm [shape: f32[16,128], index: 5, kind: output, shape index: {}]  }
   0x1   :  { %11 = vsyncpa [#allocation7], 0 }
   0x2   :  { %12 = vsyncpa [#allocation5], 0  ;;  %s547_s18 = smov [#allocation6]   ;;  %s548_s20 = smov [#allocation3]  }
   0x3   :  { %s30_s19 = sshll.u32 %s547_s18, 4  ;;  %s18_s21 = sshll.u32 %s548_s20, 4  ;;  %s31_s19 = int_to_ptr.vmem [resolvable:$true] %s30_s19  ;;  %s587_s21 = int_to_ptr.vmem [resolvable:$true] %s18_s21 }
   0x4   :  { %s453_s24 = scalar_lea.hbm %s658_s1, 1024 }
   0x5   :  { %p454_p0 = scmp.ne.s32.totalorder %s658_s1, %s453_s24  ;;  %p457_p1 = scmp.lt.u32.totalorder %s453_s24, %s658_s1 }
   0x7   :  { %p459_p2 = pnand %p457_p1, %p454_p0 }
   0x9   :  { %462 = shalt.err (!%p459_p2)
}
   0xa   :  { %s463_s29 = scalar_lea.vmem %s31_s19, 1024  ;;  %p468_p4 = scmp.lt.s32.totalorder %s31_s19, %s31_s19 }
   0xb   :  { %p464_p3 = scmp.ne.s32.totalorder %s31_s19, %s463_s29  ;;  %p469_p5 = scmp.lt.s32.totalorder %s463_s29, %s463_s29 }
   0xd   :  { %p470_p6 = por %p469_p5, %p468_p4 }
   0xf   :  { %p471_p7 = pnand %p470_p6, %p464_p3 }
  0x11   :  { %474 = shalt.err (!%p471_p7)
}
  0x12   :  { %s549_s30 = smov 64   ;;  %s550_s6 = smov 4  }
  0x13   :  { %36 = dma.hbm_to_vmem [thread:$0]  %s658_s1, 1024, %s31_s19, [#allocation7], %s549_s30, %s549_s30, %s550_s6  }
  0x14   :  { %s475_s11 = scalar_lea.hbm %s657_s0, 128 }
  0x15   :  { %p476_p8 = scmp.ne.s32.totalorder %s657_s0, %s475_s11  ;;  %p479_p9 = scmp.lt.u32.totalorder %s475_s11, %s657_s0 }
  0x17   :  { %p481_p10 = pnand %p479_p9, %p476_p8 }
  0x19   :  { %484 = shalt.err (!%p481_p10)
}
  0x1a   :  { %s485_s16 = scalar_lea.vmem %s587_s21, 128  ;;  %p490_p12 = scmp.lt.s32.totalorder %s587_s21, %s587_s21 }
  0x1b   :  { %p486_p11 = scmp.ne.s32.totalorder %s587_s21, %s485_s16  ;;  %p491_p13 = scmp.lt.s32.totalorder %s485_s16, %s485_s16 }
  0x1d   :  { %p492_p0 = por %p491_p13, %p490_p12 }
  0x1f   :  { %p493_p1 = pnand %p492_p0, %p486_p11 }
  0x21   :  { %496 = shalt.err (!%p493_p1)
}
  0x22   :  { %24 = dma.hbm_to_vmem [thread:$0]  %s657_s0, 128, %s587_s21, [#allocation4], %s549_s30, %s549_s30, %s550_s6  }
  0x23   :  { %s551_s18 = smov [#allocation8]   ;;  %s497_s23 = scalar_lea.hbm %s660_s3, 1024 }
  0x24   :  { %s44_s19 = sshll.u32 %s551_s18, 4  ;;  %p498_p2 = scmp.ne.s32.totalorder %s660_s3, %s497_s23  ;;  %s45_s19 = int_to_ptr.vmem [resolvable:$true] %s44_s19 }
  0x25   :  { %p501_p3 = scmp.lt.u32.totalorder %s497_s23, %s660_s3 }
  0x27   :  { %p503_p4 = pnand %p501_p3, %p498_p2 }
  0x29   :  { %506 = shalt.err (!%p503_p4)
}
  0x2a   :  { %s507_s28 = scalar_lea.vmem %s45_s19, 1024  ;;  %p512_p6 = scmp.lt.s32.totalorder %s45_s19, %s45_s19 }
  0x2b   :  { %p508_p5 = scmp.ne.s32.totalorder %s45_s19, %s507_s28  ;;  %p513_p7 = scmp.lt.s32.totalorder %s507_s28, %s507_s28 }
  0x2d   :  { %p514_p8 = por %p513_p7, %p512_p6 }
  0x2f   :  { %p515_p9 = pnand %p514_p8, %p508_p5 }
  0x31   :  { %518 = shalt.err (!%p515_p9)
}
  0x32   :  { %50 = dma.hbm_to_vmem [thread:$0]  %s660_s3, 1024, %s45_s19, [#allocation7], %s549_s30, %s549_s30, %s550_s6  }
  0x33   :  { %541 = dma.done.wait [#allocation4], 128  }
  0x34   :  { %542 = vsyncadd [#allocation4], 4294967168 }
  0x35   :  { %543 = dma.done.wait [#allocation7], 2048  }
  0x36   :  { %544 = vsyncadd [#allocation7], 4294965248  ;;  %v552_v0 = vmov 0.0   ;;  %vm553_vm0 = vmmov 0   ;;  %v432_v1 = vld [vmem:[#allocation6] sm:$0xff]   ;;  %v433_v2 = vld [vmem:[#allocation6 + $0x8] sm:$0xff]  }
  0x37   :  { %382 = vmatprep.subr.bf16.mxu0 %v552_v0  ;;  %398 = vmatprep.mubr.msk.bf16.mxu0 %vm553_vm0, %v552_v0  ;;  %v434_v3 = vld [vmem:[#allocation6 + $0x10] sm:$0xff]   ;;  %v441_v4 = vld [vmem:[#allocation8] sm:$0xff]   ;;  %v435_v5 = vld [vmem:[#allocation6 + $0x18] sm:$0xff]   ;;  %s554_s6 = smov [#allocation9]  }
  0x38   :  { %402 = vmatprep.subr.bf16.mxu1 %v552_v0  ;;  %418 = vmatprep.mubr.msk.bf16.mxu1 %vm553_vm0, %v552_v0  ;;  %v442_v6 = vld [vmem:[#allocation8 + $0x8] sm:$0xff]   ;;  %v436_v7 = vld [vmem:[#allocation6 + $0x20] sm:$0xff]   ;;  %v438_v9 = vld [vmem:[#allocation6 + $0x30] sm:$0xff]   ;;  %s332_s7 = sshll.u32 %s554_s6, 4  ;;  %s333_s7 = int_to_ptr.vmem [resolvable:$true] %s332_s7 }
  0x39   :  { %383 = vmatpush3.bf16.msra.mxu0 %v432_v1  ;;  %403 = vmatpush3.bf16.msra.mxu1 %v441_v4  ;;  %v437_v8 = vld [vmem:[#allocation6 + $0x28] sm:$0xff]   ;;  %v439_v10 = vld [vmem:[#allocation6 + $0x38] sm:$0xff]   ;;  %v443_v12 = vld [vmem:[#allocation8 + $0x10] sm:$0xff]   ;;  %s519_s8 = scalar_lea.vmem %s333_s7, 256  ;;  %p524_p11 = scmp.lt.s32.totalorder %s333_s7, %s333_s7 }
  0x3a   :  { %384 = vmatprep.subr.bf16.mxu0 %v552_v0  ;;  %404 = vmatprep.subr.bf16.mxu1 %v552_v0  ;;  %v440_v11 = vld [vmem:[#allocation3] sm:$0xff]   ;;  %v445_v14 = vld [vmem:[#allocation8 + $0x20] sm:$0xff]   ;;  %v446_v15 = vld [vmem:[#allocation8 + $0x28] sm:$0xff]   ;;  %p520_p10 = scmp.ne.s32.totalorder %s333_s7, %s519_s8  ;;  %p525_p12 = scmp.lt.s32.totalorder %s519_s8, %s519_s8 }
  0x3b   :  { %v444_v13 = vld [vmem:[#allocation8 + $0x18] sm:$0xff]   ;;  %v447_v16 = vld [vmem:[#allocation8 + $0x30] sm:$0xff]  }
  0x3c   :  { %v448_v17 = vld [vmem:[#allocation8 + $0x38] sm:$0xff]   ;;  %p526_p13 = por %p525_p12, %p524_p11 }
  0x3d   :  { %385 = vmatpush3.bf16.msra.mxu0 %v433_v2  ;;  %405 = vmatpush3.bf16.msra.mxu1 %v442_v6  ;;  %v345_v18 = vld [vmem:[%s659_s2] ss:$0 sm:$0xff] }
  0x3e   :  { %386 = vmatprep.subr.bf16.mxu0 %v552_v0  ;;  %406 = vmatprep.subr.bf16.mxu1 %v552_v0  ;;  %v363_v36 = vld [vmem:[%s661_s4] ss:$0 sm:$0xff]  ;;  %p527_p0 = pnand %p526_p13, %p520_p10 }
  0x41   :  { %387 = vmatpush3.bf16.msra.mxu0 %v434_v3  ;;  %407 = vmatpush3.bf16.msra.mxu1 %v443_v12 }
  0x42   :  { %388 = vmatprep.subr.bf16.mxu0 %v552_v0  ;;  %408 = vmatprep.subr.bf16.mxu1 %v552_v0 }
  0x45   :  { %389 = vmatpush3.bf16.msra.mxu0 %v435_v5  ;;  %409 = vmatpush3.bf16.msra.mxu1 %v444_v13 }
  0x46   :  { %390 = vmatprep.subr.bf16.mxu0 %v552_v0  ;;  %410 = vmatprep.subr.bf16.mxu1 %v552_v0 }
  0x49   :  { %391 = vmatpush3.bf16.msra.mxu0 %v436_v7  ;;  %411 = vmatpush3.bf16.msra.mxu1 %v445_v14 }
  0x4a   :  { %392 = vmatprep.subr.bf16.mxu0 %v552_v0  ;;  %412 = vmatprep.subr.bf16.mxu1 %v552_v0 }
  0x4d   :  { %393 = vmatpush3.bf16.msra.mxu0 %v437_v8  ;;  %413 = vmatpush3.bf16.msra.mxu1 %v446_v15 }
  0x4e   :  { %394 = vmatprep.subr.bf16.mxu0 %v552_v0  ;;  %414 = vmatprep.subr.bf16.mxu1 %v552_v0 }
  0x51   :  { %395 = vmatpush3.bf16.msra.mxu0 %v438_v9  ;;  %415 = vmatpush3.bf16.msra.mxu1 %v447_v16 }
  0x52   :  { %396 = vmatprep.subr.bf16.mxu0 %v552_v0  ;;  %416 = vmatprep.subr.bf16.mxu1 %v552_v0 }
  0x55   :  { %397 = vmatpush3.bf16.msra.mxu0 %v439_v10  ;;  %417 = vmatpush3.bf16.msra.mxu1 %v448_v17 }
  0x58   :  { %399 = vmatmul.mubr.bf16.vlgmr.msra.gmra.mrb[0].mxu0 %v440_v11 }
 0x12b   :  { %v182_v19 = vpop.f32.mrb[0].mxu0 }
 0x12c   :  { %v183_v20 = vadd.f32 %v345_v18, %v182_v19  ;;  %v400_v21 = vpop.f32.mrb[1].mxu0 }
 0x12d   :  { %v185_v22 = vpop.f32.mrb[2].mxu0 }
 0x12e   :  { %v191_v23 = vmul.f32 0.70710677, %v183_v20  ;;  %v186_v24 = vadd.f32 %v345_v18, %v185_v22  ;;  %v401_v25 = vpop.f32.mrb[3].mxu0  ;;  %v189_v30 = vmul.f32 0.5, %v183_v20 }
 0x130   :  { %449 = verf.f32 %v191_v23  ;;  %v192_v26 = vmul.f32 0.70710677, %v186_v24  ;;  %v190_v31 = vmul.f32 0.5, %v186_v24 }
 0x132   :  { %451 = verf.f32 %v192_v26 }
 0x13a   :  { %v450_v27 = vpop.eup %449 }
 0x13b   :  { %v195_v28 = vadd.f32 1.0, %v450_v27 }
 0x13c   :  { %v452_v29 = vpop.eup %451 }
 0x13d   :  { %v196_v32 = vadd.f32 1.0, %v452_v29  ;;  %v197_v33 = vmul.f32 %v195_v28, %v189_v30 }
 0x13f   :  { %v198_v34 = vmul.f32 %v196_v32, %v190_v31 }
 0x141   :  { %v201_v35 = vpack.c.bf16 %v198_v34, %v197_v33 }
 0x143   :  { %419 = vmatmul.mubr.bf16.vlgmr.msra.gmra.mrb[0].mxu1 %v201_v35 }
 0x216   :  { %v300_v37 = vpop.f32.mrb[0].mxu1 }
 0x217   :  { %v323_v38 = vadd.f32 %v363_v36, %v300_v37  ;;  %v420_v39 = vpop.f32.mrb[1].mxu1 }
 0x218   :  { %v303_v40 = vpop.f32.mrb[2].mxu1 }
 0x219   :  { %325 = vst [vmem:[#allocation9] sm:$0xff] %v323_v38  ;;  %v324_v41 = vadd.f32 %v363_v36, %v303_v40  ;;  %v421_v42 = vpop.f32.mrb[3].mxu1 }
 0x21b   :  { %326 = vst [vmem:[#allocation9 + $0x8] sm:$0xff] %v324_v41 }
 0x21c   :  { %530 = shalt.err (!%p527_p0)
}
 0x21d   :  { %s531_s10 = scalar_lea.hbm %s662_s5, 256 }
 0x21e   :  { %p532_p1 = scmp.ne.s32.totalorder %s662_s5, %s531_s10  ;;  %p535_p2 = scmp.lt.u32.totalorder %s531_s10, %s662_s5 }
 0x220   :  { %p537_p3 = pnand %p535_p2, %p532_p1 }
 0x222   :  { %540 = shalt.err (!%p537_p3)
}
 0x223   :  { %s555_s15 = smov 128   ;;  %s556_s16 = smov 8  }
 0x224   :  { %338 = dma.vmem_to_hbm [thread:$0]  %s333_s7, 256, %s662_s5, [#allocation5], %s555_s15, %s555_s15, %s556_s16  }
 0x225   :  { %545 = dma.done.wait [#allocation5], 256  }
 0x226   :  { %546 = vsyncadd [#allocation5], 4294967040 }
 0x227   :  { %342 = vsyncpa [#allocation4], 1 }
 0x228   :  { %343 = vsyncpa [#allocation7], 1 }
 0x229   :  { %344 = vsyncpa [#allocation5], 1 }

</bundles_post_ra>
